<compile_context>
chip_gen: v5e
topology: v5e:2x2
jax: 0.10.0
libtpu: 0.0.40
codegen_flags: <defaults>
</compile_context>

<pallas_src>
import functools

import jax
import jax.numpy as jnp
from jax.experimental import pallas as pl
from jax.experimental.pallas import tpu as pltpu

EPS_BN = 1e-5
_FOLD_K_MAX_C = 128          # fold dx taps into the matmul K dim only below this width

_VMEM_LIMIT_CACHE = [None]


def _vmem_limit_bytes():
    """Generation-aware VMEM limit: ~0.75 * physical (96 MiB v5e/v6e, 48 MiB v7x)."""
    if _VMEM_LIMIT_CACHE[0] is None:
        limit = 64 * 1024 * 1024
        try:
            cap = getattr(pltpu.get_tpu_info(), "vmem_capacity_bytes", None)
            if cap:
                limit = int(0.75 * cap)
        except Exception:
            pass
        _VMEM_LIMIT_CACHE[0] = limit
    return _VMEM_LIMIT_CACHE[0]


def _pick_band_rows(h, target):
    """Largest divisor t of h with t % 4 == 0 (so 2t % 8 == 0) or t == h, t <= target."""
    cands = [t for t in range(1, h + 1) if h % t == 0 and (t % 4 == 0 or t == h)]
    best = [t for t in cands if t <= max(4, target)]
    return max(best) if best else min(cands)


# ----------------------------------------------------------------------------
# In-kernel helpers (operate on VMEM values)
# ----------------------------------------------------------------------------
def _shift_cols(x, d):
    """y[:, c, :] = x[:, c + d, :] with zeros outside [0, W).  d in {-1, 0, +1}."""
    if d == 0:
        return x
    r, w, c = x.shape
    zero = jnp.zeros((r, 1, c), x.dtype)
    if d < 0:
        return jnp.concatenate([zero, x[:, :w - 1, :]], axis=1)
    return jnp.concatenate([x[:, 1:, :], zero], axis=1)


def _upsample2x(x):
    """Nearest-neighbour 2x upsample of an (H, W, C) value, entirely in VMEM."""
    h, w, c = x.shape
    x = jnp.broadcast_to(x[:, :, None, :], (h, w, 2, c)).reshape(h, 2 * w, c)
    x = jnp.broadcast_to(x[:, None, :, :], (h, 2, 2 * w, c)).reshape(2 * h, 2 * w, c)
    return x


# ----------------------------------------------------------------------------
# Pallas kernels
# ----------------------------------------------------------------------------
def _stats_kernel(x_ref, o_ref, *, nrows):
    """Accumulate per-lane [sum; sumsq] over row tiles (output block is resident)."""
    @pl.when(pl.program_id(0) == 0)
    def _():
        o_ref[...] = jnp.zeros_like(o_ref)

    x = x_ref[...]
    tile = x.shape[0]
    if nrows % tile:   # ragged last tile: mask rows past the true extent
        row = pl.program_id(0) * tile + jax.lax.broadcasted_iota(jnp.int32, (tile, 1), 0)
        x = jnp.where(row < nrows, x, 0.0)
    s = jnp.sum(x, axis=0, keepdims=True)
    ss = jnp.sum(x * x, axis=0, keepdims=True)
    o_ref[...] += jnp.concatenate([s, ss], axis=0)


def _conv1_kernel(x_ref, sc_ref, sh_ref, wp_ref, b_ref, o_ref, st_ref, xp_ref, *, tbl):
    """CBN1 + ReLU + (nearest-2x upsample o 3x3 conv) via the 4-output-parity
    decomposition + bias, for one low-res row band of one sample.  Also emits the
    band's per-channel sum / sum-of-squares so CBN2 needs no extra HBM pass over y1."""
    _, h, w, cin = x_ref.shape
    cout = b_ref.shape[1]
    band = pl.program_id(1)

    # Row-padded, CBN+ReLU'd, bf16 activation built once per sample (band 0).
    # Band axis is "arbitrary", so bands of a sample run in order on one core.
    @pl.when(band == 0)
    def _():
        act = jnp.maximum(x_ref[0] * sc_ref[0] + sh_ref[0], 0.0)          # f32 elementwise
        xp_ref[0:1, :, :] = jnp.zeros((1, w, cin), jnp.bfloat16)
        xp_ref[h + 1:h + 2, :, :] = jnp.zeros((1, w, cin), jnp.bfloat16)
        xp_ref[1:h + 1, :, :] = act.astype(jnp.bfloat16)

    row0 = pl.multiple_of(band * tbl, tbl)
    xb = xp_ref[pl.ds(row0, tbl + 2), :, :]                               # (tbl+2, w, cin)
    wp = wp_ref[...]                                                      # (4, 2, 2cin, cout)

    def parity(pi, pj):
        acc = jnp.zeros((tbl * w, cout), jnp.float32)
        for dyp in range(2):
            slab = xb[pi + dyp:pi + dyp + tbl]                            # (tbl, w, cin)
            patch = jnp.concatenate(
                [_shift_cols(slab, pj - 1), _shift_cols(slab, pj)], axis=-1)
            acc += jnp.dot(patch.reshape(tbl * w, 2 * cin), wp[2 * pi + pj, dyp],
                           preferred_element_type=jnp.float32)
        return acc.reshape(tbl, w, cout)

    p00, p01, p10, p11 = parity(0, 0), parity(0, 1), parity(1, 0), parity(1, 1)
    row_e = jnp.stack([p00, p01], axis=2).reshape(tbl, 2 * w, cout)       # even out rows
    row_o = jnp.stack([p10, p11], axis=2).reshape(tbl, 2 * w, cout)       # odd  out rows
    y = jnp.stack([row_e, row_o], axis=1).reshape(2 * tbl, 2 * w, cout) + b_ref[...]

    yf = y.reshape(4 * tbl * w, cout)
    s = jnp.sum(yf, axis=0, keepdims=True)
    ss = jnp.sum(yf * yf, axis=0, keepdims=True)
    st_ref[...] = jnp.concatenate([s, ss], axis=0).reshape(1, 1, 2, cout)
    o_ref[...] = y.reshape(1, 2 * tbl, 2 * w * cout)                      # lane-dense store


def _conv2_kernel(y_ref, sc_ref, sh_ref, w_ref, b_ref, x0_ref, w0_ref, b0_ref,
                  o_ref, yp_ref, *, tbl, fold):
    """CBN2 + ReLU + 3x3 conv + bias + fused 1x1 shortcut (computed at the
    pre-upsample resolution, replicated 2x in VMEM), one output row band per step."""
    _, hh, ww, cmid = y_ref.shape
    _, _, w, cin = x0_ref.shape
    cout = b_ref.shape[1]
    tb2 = 2 * tbl
    band = pl.program_id(1)

    @pl.when(band == 0)
    def _():
        act = jnp.maximum(y_ref[0] * sc_ref[0] + sh_ref[0], 0.0)
        yp_ref[0:1, :, :] = jnp.zeros((1, ww, cmid), jnp.bfloat16)
        yp_ref[hh + 1:hh + 2, :, :] = jnp.zeros((1, ww, cmid), jnp.bfloat16)
        yp_ref[1:hh + 1, :, :] = act.astype(jnp.bfloat16)

    row0 = pl.multiple_of(band * tb2, tb2)
    yb = yp_ref[pl.ds(row0, tb2 + 2), :, :]                               # (tb2+2, ww, cmid)
    wv = w_ref[...]

    acc = jnp.zeros((tb2 * ww, cout), jnp.float32)
    for dy in range(3):
        slab = yb[dy:dy + tb2]                                            # (tb2, ww, cmid)
        if fold:     # Cmid < 128: fold dx taps into K = 3*Cmid (fewer, fatter matmuls)
            patch = jnp.concatenate(
                [_shift_cols(slab, -1), slab, _shift_cols(slab, 1)], axis=-1)
            acc += jnp.dot(patch.reshape(tb2 * ww, 3 * cmid), wv[dy],
                           preferred_element_type=jnp.float32)
        else:        # Cmid >= 128: K already saturates the MXU; skip the lane concat
            for dx in range(3):
                acc += jnp.dot(_shift_cols(slab, dx - 1).reshape(tb2 * ww, cmid),
                               wv[dy, dx], preferred_element_type=jnp.float32)
    conv = acc.reshape(tb2, ww, cout) + b_ref[...]

    # 1x1 shortcut at low resolution (commutes with nearest 2x upsample).
    rlo = pl.multiple_of(band * tbl, tbl)
    x0b = x0_ref[:, pl.ds(rlo, tbl), :, :][0].astype(jnp.bfloat16)        # (tbl, w, cin)
    s = jnp.dot(x0b.reshape(tbl * w, cin), w0_ref[...],
                preferred_element_type=jnp.float32) + b0_ref[...]
    s = _upsample2x(s.reshape(tbl, w, cout))                              # (tb2, ww, cout)
    o_ref[...] = (conv + s).reshape(1, tb2, ww * cout)                    # lane-dense store


# ----------------------------------------------------------------------------
# pallas_call wrappers
# ----------------------------------------------------------------------------
def channel_stats(x_nhwc, target_rows=2048):
    """Per-channel mean and rsqrt(var+eps) over (N, H, W) via a tiled Pallas reduction.

    For C < 128, k = 128 // C consecutive rows are packed into the lane dim (lane-dense
    reduction) and un-folded with a tiny host-side sum."""
    n, h, w, c = x_nhwc.shape
    r = n * h * w
    k = 1
    if c < 128:
        k = max(1, 128 // c)
        while k > 1 and r % k:
            k -= 1
    rows, cols = r // k, k * c
    x2 = x_nhwc.reshape(rows, cols)
    tile = rows if rows <= target_rows else target_rows                  # target % 8 == 0
    grid = pl.cdiv(rows, tile)

    sums = pl.pallas_call(
        functools.partial(_stats_kernel, nrows=rows),
        out_shape=jax.ShapeDtypeStruct((2, cols), jnp.float32),
        grid=(grid,),
        in_specs=[pl.BlockSpec((tile, cols), lambda i: (i, 0))],
        out_specs=pl.BlockSpec((2, cols), lambda i: (0, 0)),
        compiler_params=pltpu.CompilerParams(dimension_semantics=("arbitrary",)),
    )(x2)
    sums = sums.reshape(2, k, c).sum(axis=1)
    mean = sums[0] / r
    # TODO(synk): single-pass E[x^2]-mean^2 can cancel for large-mean activations;
    # switch to a shifted accumulation if production stats need tighter accuracy.
    var = sums[1] / r - mean * mean
    return mean, jax.lax.rsqrt(var + EPS_BN)


def _fold_upconv_weights(w_hwio):
    """Fold a 3x3 HWIO kernel (applied after nearest-2x upsample) into four 2x2
    kernels, one per output parity; each as (2, 2*Cin, Cout) with dx' in the K dim."""
    W = w_hwio                                                   # (3, 3, cin, cout)
    A = [jnp.stack([W[0], W[1] + W[2]]),                         # pi = 0: rows (r-1, r)
         jnp.stack([W[0] + W[1], W[2]])]                         # pi = 1: rows (r, r+1)
    parts = []
    for pi in range(2):
        for pj in range(2):
            Ap = A[pi]                                           # (2, 3, cin, cout)
            if pj == 0:
                k0, k1 = Ap[:, 0], Ap[:, 1] + Ap[:, 2]
            else:
                k0, k1 = Ap[:, 0] + Ap[:, 1], Ap[:, 2]
            parts.append(jnp.concatenate([k0, k1], axis=1))      # (2, 2*cin, cout)
    return jnp.stack(parts)                                      # (4, 2, 2*cin, cout)


def conv1_block(x, scale, shift, w_hwio, bias, band_rows=8):
    n, h, w, cin = x.shape
    cout = w_hwio.shape[-1]
    hh, ww = 2 * h, 2 * w
    tbl = _pick_band_rows(h, band_rows)
    nb = h // tbl
    wp = _fold_upconv_weights(w_hwio).astype(jnp.bfloat16)

    return pl.pallas_call(
        functools.partial(_conv1_kernel, tbl=tbl),
        out_shape=(jax.ShapeDtypeStruct((n, hh, ww * cout), jnp.float32),
                   jax.ShapeDtypeStruct((n, nb, 2, cout), jnp.float32)),
        grid=(n, nb),
        in_specs=[
            pl.BlockSpec((1, h, w, cin), lambda i, b: (i, 0, 0, 0)),
            pl.BlockSpec((1, 1, cin), lambda i, b: (i, 0, 0)),
            pl.BlockSpec((1, 1, cin), lambda i, b: (i, 0, 0)),
            pl.BlockSpec((4, 2, 2 * cin, cout), lambda i, b: (0, 0, 0, 0)),
            pl.BlockSpec((1, cout), lambda i, b: (0, 0)),
        ],
        out_specs=(pl.BlockSpec((1, 2 * tbl, ww * cout), lambda i, b: (i, b, 0)),
                   pl.BlockSpec((1, 1, 2, cout), lambda i, b: (i, b, 0, 0))),
        scratch_shapes=[pltpu.VMEM((h + 2, w, cin), jnp.bfloat16)],
        compiler_params=pltpu.CompilerParams(
            dimension_semantics=("parallel", "arbitrary"),
            vmem_limit_bytes=_vmem_limit_bytes()),
    )(x, scale.reshape(n, 1, cin), shift.reshape(n, 1, cin), wp, bias.reshape(1, cout))


def conv2_block(y, scale, shift, w_hwio, bias, x0, w0_io, b0, band_rows=8):
    n, hh, ww, cmid = y.shape
    _, h, w, cin = x0.shape
    cout = w_hwio.shape[-1]
    tbl = _pick_band_rows(h, band_rows)           # low-res rows/band (output band = 2*tbl)
    nb = h // tbl
    fold = cmid < _FOLD_K_MAX_C
    w2 = w_hwio.astype(jnp.bfloat16)
    if fold:
        w2 = w2.reshape(3, 3 * cmid, cout)
        w2_spec = pl.BlockSpec((3, 3 * cmid, cout), lambda i, b: (0, 0, 0))
    else:
        w2_spec = pl.BlockSpec((3, 3, cmid, cout), lambda i, b: (0, 0, 0, 0))

    return pl.pallas_call(
        functools.partial(_conv2_kernel, tbl=tbl, fold=fold),
        out_shape=jax.ShapeDtypeStruct((n, hh, ww * cout), jnp.float32),
        grid=(n, nb),
        in_specs=[
            pl.BlockSpec((1, hh, ww, cmid), lambda i, b: (i, 0, 0, 0)),
            pl.BlockSpec((1, 1, cmid), lambda i, b: (i, 0, 0)),
            pl.BlockSpec((1, 1, cmid), lambda i, b: (i, 0, 0)),
            w2_spec,
            pl.BlockSpec((1, cout), lambda i, b: (0, 0)),
            pl.BlockSpec((1, h, w, cin), lambda i, b: (i, 0, 0, 0)),
            pl.BlockSpec((cin, cout), lambda i, b: (0, 0)),
            pl.BlockSpec((1, cout), lambda i, b: (0, 0)),
        ],
        out_specs=pl.BlockSpec((1, 2 * tbl, ww * cout), lambda i, b: (i, b, 0)),
        scratch_shapes=[pltpu.VMEM((hh + 2, ww, cmid), jnp.bfloat16)],
        compiler_params=pltpu.CompilerParams(
            dimension_semantics=("parallel", "arbitrary"),
            vmem_limit_bytes=_vmem_limit_bytes()),
    )(y, scale.reshape(n, 1, cmid), shift.reshape(n, 1, cmid), w2,
      bias.reshape(1, cout), x0, w0_io.astype(jnp.bfloat16), b0.reshape(1, cout))


# ----------------------------------------------------------------------------
# Parameter construction (deterministic, synthetic) — weight preprocessing glue
# ----------------------------------------------------------------------------
def spectral_normalize(w_oikk, key, n_power_iterations=1, eps=1e-12):
    cout = w_oikk.shape[0]
    w_mat = w_oikk.reshape(cout, -1)
    u = jax.random.normal(key, (cout,), jnp.float32)
    u = u / (jnp.linalg.norm(u) + eps)
    v = None
    for _ in range(n_power_iterations):
        v = w_mat.T @ u
        v = v / (jnp.linalg.norm(v) + eps)
        u = w_mat @ v
        u = u / (jnp.linalg.norm(u) + eps)
    sigma = u @ (w_mat @ v)
    return w_oikk / sigma


def init_conv(key, cout, cin, k):
    wk, uk, bk = jax.random.split(key, 3)
    fan_in = cin * k * k
    bound = 1.0 / jnp.sqrt(fan_in)
    w = jax.random.uniform(wk, (cout, cin, k, k), jnp.float32, -bound, bound)
    w = spectral_normalize(w, uk)
    b = jax.random.uniform(bk, (cout,), jnp.float32, -bound, bound)
    return w, b


def init_genblock_params(key, in_ch, out_ch, num_classes):
    k1, k2, k0 = jax.random.split(key, 3)
    w1, b1 = init_conv(k1, out_ch, in_ch, 3)   # snconv2d1
    w2, b2 = init_conv(k2, out_ch, out_ch, 3)  # snconv2d2
    w0, b0 = init_conv(k0, out_ch, in_ch, 1)   # snconv2d0
    embed1 = jnp.concatenate(
        [jnp.ones((num_classes, in_ch), jnp.float32),
         jnp.zeros((num_classes, in_ch), jnp.float32)], axis=1)
    embed2 = jnp.concatenate(
        [jnp.ones((num_classes, out_ch), jnp.float32),
         jnp.zeros((num_classes, out_ch), jnp.float32)], axis=1)
    return {
        "in_ch": in_ch, "out_ch": out_ch,
        "conv1_w": jnp.transpose(w1, (2, 3, 1, 0)), "conv1_b": b1,   # HWIO
        "conv2_w": jnp.transpose(w2, (2, 3, 1, 0)), "conv2_b": b2,   # HWIO
        "conv0_w": w0[:, :, 0, 0].T, "conv0_b": b0,                  # (Cin, Cout)
        "embed1": embed1, "embed2": embed2,
    }


# ----------------------------------------------------------------------------
# GenBlock forward (Pallas) and pure-JAX reference
# ----------------------------------------------------------------------------
def gen_block_forward(params, x_nchw, labels, band_rows=8):
    in_ch, out_ch = params["in_ch"], params["out_ch"]
    x = jnp.transpose(x_nchw, (0, 2, 3, 1)).astype(jnp.float32)      # NCHW -> NHWC
    n, h, w, _ = x.shape
    hh, ww = 2 * h, 2 * w

    # CBN1: global batch stats + per-sample (gamma, beta) folded into scale/shift.
    e1 = params["embed1"][labels]
    g1, be1 = e1[:, :in_ch], e1[:, in_ch:]
    mean1, inv1 = channel_stats(x)
    scale1 = g1 * inv1[None, :]
    shift1 = be1 - mean1[None, :] * scale1

    # Fused CBN1 + ReLU + up2x∘conv3x3 (4-parity) + bias; also returns y1 sum/sumsq.
    y1, st1 = conv1_block(x, scale1, shift1, params["conv1_w"], params["conv1_b"],
                          band_rows=band_rows)

    # CBN2 statistics from the fused per-band sums (no extra HBM pass over y1).
    cnt = n * hh * ww
    sums2 = st1.sum(axis=(0, 1))                                     # (2, out_ch)
    mean2 = sums2[0] / cnt
    var2 = sums2[1] / cnt - mean2 * mean2
    inv2 = jax.lax.rsqrt(var2 + EPS_BN)
    e2 = params["embed2"][labels]
    g2, be2 = e2[:, :out_ch], e2[:, out_ch:]
    scale2 = g2 * inv2[None, :]
    shift2 = be2 - mean2[None, :] * scale2

    # Fused CBN2 + ReLU + conv3x3 + bias + (1x1 shortcut, upsampled in VMEM).
    out = conv2_block(y1.reshape(n, hh, ww, out_ch), scale2, shift2,
                      params["conv2_w"], params["conv2_b"],
                      x, params["conv0_w"], params["conv0_b"], band_rows=band_rows)
    out = out.reshape(n, hh, ww, out_ch)
    return jnp.transpose(out, (0, 3, 1, 2))                          # NHWC -> NCHW


def reference_forward(params, x_nchw, labels):
    """Pure-JAX/XLA reference mirroring the PyTorch GenBlock (training-mode BN)."""
    in_ch, out_ch = params["in_ch"], params["out_ch"]
    x = jnp.transpose(x_nchw, (0, 2, 3, 1)).astype(jnp.float32)

    def bn(v):
        m = jnp.mean(v, axis=(0, 1, 2))
        va = jnp.mean(jnp.square(v - m), axis=(0, 1, 2))
        return (v - m) * jax.lax.rsqrt(va + EPS_BN)

    def up2(v):
        return jnp.repeat(jnp.repeat(v, 2, axis=1), 2, axis=2)

    def conv(v, w_hwio, b, pad):
        y = jax.lax.conv_general_dilated(
            v, w_hwio, (1, 1), [(pad, pad), (pad, pad)],
            dimension_numbers=("NHWC", "HWIO", "NHWC"),
            precision=jax.lax.Precision.HIGHEST)
        return y + b

    e1 = params["embed1"][labels]
    h = bn(x) * e1[:, None, None, :in_ch] + e1[:, None, None, in_ch:]
    h = up2(jnp.maximum(h, 0.0))
    h = conv(h, params["conv1_w"], params["conv1_b"], 1)
    e2 = params["embed2"][labels]
    h2 = bn(h) * e2[:, None, None, :out_ch] + e2[:, None, None, out_ch:]
    h2 = conv(jnp.maximum(h2, 0.0), params["conv2_w"], params["conv2_b"], 1)
    s = conv(up2(x), params["conv0_w"][None, None, :, :], params["conv0_b"], 0)
    return jnp.transpose(h2 + s, (0, 3, 1, 2))


# ----------------------------------------------------------------------------
if __name__ == "__main__":
    key = jax.random.PRNGKey(0)
    kx, kp, kl = jax.random.split(key, 3)

    B, C_IN, C_OUT, NUM_CLASSES, H, W = 2, 4, 8, 5, 16, 16
    x = jax.random.normal(kx, (B, C_IN, H, W), jnp.float32)          # NCHW
    labels = jax.random.randint(kl, (B,), 0, NUM_CLASSES)

    params = init_genblock_params(kp, C_IN, C_OUT, NUM_CLASSES)

    out = jax.block_until_ready(gen_block_forward(params, x, labels))
    assert out.shape == (B, C_OUT, 2 * H, 2 * W), out.shape
    assert out.dtype == jnp.float32

    ref = jax.block_until_ready(reference_forward(params, x, labels))
    err = float(jnp.max(jnp.abs(out - ref)))
    assert err < 5e-2, f"max abs error vs reference: {err}"
    print("KERNEL_OK")
</pallas_src>

<mosaic_0001>
module attributes {stable_mosaic.version = 11 : i64} {
  func.func @_stats_kernel(%arg0: i32, %arg1: memref<16x128xf32, #tpu.memory_space<vmem>>, %arg2: memref<2x128xf32, #tpu.memory_space<vmem>>) attributes {dimension_semantics = [#tpu.dimension_semantics<arbitrary>], iteration_bounds = array<i64: 1>, scalar_prefetch = 0 : i64, scratch_operands = 0 : i64, tpu.core_type = #tpu.core_type<tc>, window_params = [{transform_indices = @transform_0, window_bounds = array<i64: 16, 128>}, {pipeline_mode = #tpu.pipeline_mode<synchronous>, transform_indices = @transform_1, window_bounds = array<i64: 2, 128>}]} {
    %c0_i32 = arith.constant 0 : i32
    %0 = arith.cmpi eq, %arg0, %c0_i32 : i32
    %1 = arith.extui %0 : i1 to i32
    %c0_i32_0 = arith.constant 0 : i32
    %2 = arith.cmpi ne, %1, %c0_i32_0 : i32
    scf.if %2 {
      %cst_7 = arith.constant 0.000000e+00 : f32
      %13 = vector.broadcast %cst_7 : f32 to vector<2x128xf32>
      %c0_8 = arith.constant 0 : index
      %c0_9 = arith.constant 0 : index
      %14 = vector.load %arg2[%c0_8, %c0_9] : memref<2x128xf32, #tpu.memory_space<vmem>>, vector<2x128xf32>
      tpu.vector_store %arg2[%c0_8, %c0_9], %13 {strides = array<i32>} : memref<2x128xf32, #tpu.memory_space<vmem>>, vector<2x128xf32>,
    } else {
    }
    %c0 = arith.constant 0 : index
    %c0_1 = arith.constant 0 : index
    %3 = vector.load %arg1[%c0, %c0_1] : memref<16x128xf32, #tpu.memory_space<vmem>>, vector<16x128xf32>
    %cst = arith.constant dense<0.000000e+00> : vector<128xf32>
    %4 = vector.multi_reduction <add>, %3, %cst [0] : vector<16x128xf32> to vector<128xf32>
    %5 = vector.shape_cast %4 : vector<128xf32> to vector<1x128xf32>
    %6 = arith.mulf %3, %3 : vector<16x128xf32>
    %cst_2 = arith.constant dense<0.000000e+00> : vector<128xf32>
    %7 = vector.multi_reduction <add>, %6, %cst_2 [0] : vector<16x128xf32> to vector<128xf32>
    %8 = vector.shape_cast %7 : vector<128xf32> to vector<1x128xf32>
    %c0_3 = arith.constant 0 : index
    %c0_4 = arith.constant 0 : index
    %9 = vector.load %arg2[%c0_3, %c0_4] : memref<2x128xf32, #tpu.memory_space<vmem>>, vector<2x128xf32>
    %10 = tpu.concatenate %5, %8 in 0 : vector<1x128xf32>, vector<1x128xf32> -> vector<2x128xf32>
    %11 = arith.addf %9, %10 : vector<2x128xf32>
    %c0_5 = arith.constant 0 : index
    %c0_6 = arith.constant 0 : index
    %12 = vector.load %arg2[%c0_5, %c0_6] : memref<2x128xf32, #tpu.memory_space<vmem>>, vector<2x128xf32>
    tpu.vector_store %arg2[%c0_5, %c0_6], %11 {strides = array<i32>} : memref<2x128xf32, #tpu.memory_space<vmem>>, vector<2x128xf32>,
    return
  }
  func.func @transform_0(%arg0: i32) -> (i32, i32) {
    %c0_i32 = arith.constant 0 : i32
    %c0_i32_0 = arith.constant 0 : i32
    return %arg0, %c0_i32 : i32, i32
  }
  func.func @transform_1(%arg0: i32) -> (i32, i32) {
    %c0_i32 = arith.constant 0 : i32
    %c0_i32_0 = arith.constant 0 : i32
    %c0_i32_1 = arith.constant 0 : i32
    return %c0_i32, %c0_i32_0 : i32, i32
  }
}

</mosaic_0001>

<bundles_post_ra>
// kernel: tpu_custom_call.1
= control target key start
LH: loop header
LB: loop body
LE: loop exit
PB: predicated region body
PF: predicated region fallthrough
CT: control target
= control target key end

     0   :  { %6 = vsyncpa [#allocation3], 0  ;;  %s148_s0 = inlined_call_operand.hbm [shape: f32[16,128], index: 0, kind: input, shape index: {}]   ;;  %s149_s1 = inlined_call_operand.hbm [shape: f32[2,128], index: 1, kind: output, shape index: {}]  }
   0x1   :  { %7 = vsyncpa [#allocation4], 0  ;;  %s12_s8 = sshll.u32 %s148_s0, 4  ;;  %s127_s9 = smov [#allocation2]   ;;  %s13_s8 = int_to_ptr.hbm [resolvable:$true] %s12_s8 }
   0x2   :  { %s14_s10 = sshll.u32 %s127_s9, 4  ;;  %s128_s11 = smov 128   ;;  %s15_s10 = int_to_ptr.vmem [resolvable:$true] %s14_s10 }
   0x3   :  { %s129_s12 = smov 8  }
   0x4   :  { %20 = dma.hbm_to_vmem [thread:$0]  %s13_s8, 256, %s15_s10, [#allocation3], %s128_s11, %s128_s11, %s129_s12  }
   0x5   :  { %123 = dma.done.wait [#allocation3], 256  }
   0x6   :  { %124 = vsyncadd [#allocation3], 4294967040  ;;  %v130_v0 = vmov 0.0   ;;  %v30_v1 = vld [vmem:[#allocation2] sm:$0xff]  ;;  %v31_v2 = vld [vmem:[#allocation2 + $0x8] sm:$0xff]  ;;  %vm49_vm0 = vcmask 1040384  }
   0x7   :  { %29 = vst [vmem:[#allocation5] sm:$0x3] %v130_v0  ;;  %v32_v3 = vadd.f32 %v31_v2, %v30_v1  ;;  %v39_v4 = vmul.f32 %v30_v1, %v30_v1  ;;  %v40_v5 = vmul.f32 %v31_v2, %v31_v2  ;;  %s131_s0 = smov [#allocation5]   ;;  %s60_s16 = sshll.u32 %s149_s1, 4  ;;  %s61_s16 = int_to_ptr.hbm [resolvable:$true] %s60_s16 }
   0x8   :  { %s58_s13 = sshll.u32 %s131_s0, 4  ;;  %s59_s13 = int_to_ptr.vmem [resolvable:$true] %s58_s13 }
   0x9   :  { %v33_v6 = vrot.slane %v32_v3, 4  ;;  %v41_v7 = vadd.f32 %v40_v5, %v39_v4 }
   0xb   :  { %v34_v8 = vadd.f32 %v33_v6, %v32_v3  ;;  %v42_v9 = vrot.slane %v41_v7, 4 }
   0xd   :  { %v35_v10 = vrot.slane %v34_v8, 2  ;;  %v43_v11 = vadd.f32 %v42_v9, %v41_v7 }
   0xe   :  { %v48_v19 = vld [vmem:[#allocation5] sm:$0x3] }
   0xf   :  { %v36_v12 = vadd.f32 %v35_v10, %v34_v8  ;;  %v44_v13 = vrot.slane %v43_v11, 2 }
  0x11   :  { %v37_v14 = vrot.slane %v36_v12, 1  ;;  %v45_v15 = vadd.f32 %v44_v13, %v43_v11 }
  0x13   :  { %v38_v16 = vadd.f32 %v37_v14, %v36_v12  ;;  %v46_v17 = vrot.slane %v45_v15, 1 }
  0x15   :  { %v47_v18 = vadd.f32 %v46_v17, %v45_v15 }
  0x17   :  { %v50_v20 = vsel %vm49_vm0, %v38_v16, %v47_v18 }
  0x18   :  { %v51_v21 = vadd.f32 %v50_v20, %v48_v19 }
  0x1a   :  { %52 = vst [vmem:[#allocation5] sm:$0x3] %v51_v21 }
  0x1b   :  { %63 = dma.vmem_to_hbm [thread:$0]  %s59_s13, 32, %s61_s16, [#allocation4]  }
  0x1c   :  { %125 = dma.done.wait [#allocation4], 32  }
  0x1d   :  { %126 = vsyncadd [#allocation4], 4294967264 }
  0x1e   :  { %68 = vsyncpa [#allocation3], 1 }
  0x1f   :  { %69 = vsyncpa [#allocation4], 1 }

</bundles_post_ra>
